<compile_context>
chip_gen: v7x
topology: tpu7x:2x2x1
jax: 0.10.0
libtpu: 0.0.40
codegen_flags: <defaults>
</compile_context>

<pallas_src>
import functools

import jax
import jax.numpy as jnp
from jax.experimental import pallas as pl
from jax.experimental.pallas import tpu as pltpu

jax.config.update("jax_default_matmul_precision", "float32")

CONV_K = 10      # self.conv_kernel_num
EMB_ROWS = 8     # nn.Embedding(8, embedding_dim)
ENC_OUT = 4      # encoder output width  (Linear(6, 4))
DEC_OUT = 8      # decoder output width  (Linear(6, 8))


def _full_spec(shape):
    # whole-array block (tiny operands), grid=(1,)
    return pl.BlockSpec(shape, lambda i: (0,) * len(shape))


def _make_fused_kernel(batch, sequence_len):
    """Single fused kernel: encoder + decoder + embedding + conv/relu + predict."""
    SEQ = sequence_len
    S = SEQ - 2
    K = CONV_K
    B = batch

    def kernel(x_ref, cond_ref,
               w1t_ref, b1_ref, w2t_ref, b2_ref,
               w3t_ref, b3_ref, w4t_ref, b4_ref,
               wext_ref, bc_ref, wp_ref, bp_ref,
               encdec_ref, pred_ref):
        f32 = jnp.float32
        x = x_ref[...]                                            # (N, F)
        n = x.shape[0]

        # ---------------- encoder / decoder MLP chain ----------------
        h = jnp.tanh(jnp.dot(x, w1t_ref[...], preferred_element_type=f32)
                     + b1_ref[...])
        enc = jnp.dot(h, w2t_ref[...], preferred_element_type=f32) + b2_ref[...]
        g = jnp.tanh(jnp.dot(enc, w3t_ref[...], preferred_element_type=f32)
                     + b3_ref[...])
        dec = jax.nn.sigmoid(
            jnp.dot(g, w4t_ref[...], preferred_element_type=f32) + b4_ref[...])
        # lane-packed (N, ENC_OUT + DEC_OUT): single store region, split in wrapper.
        encdec_ref[...] = jnp.concatenate([enc, dec], axis=1)

        # ------ embedding lookup folded into the conv operand (one-hot) ------
        # precondition: condition values lie in [0, EMB_ROWS)  (PyTorch would
        # raise on out-of-range indices; here they would read a zero embedding).
        lane_ids = jax.lax.broadcasted_iota(jnp.int32, (n, EMB_ROWS), 1)
        onehot = (lane_ids == cond_ref[...]).astype(f32)          # (N, 8)
        xext = jnp.concatenate([onehot, x], axis=1)               # (N, 8 + F)

        # ---- Conv2d(1, K, (3, D)) + ReLU: 3 full-N matmuls + row shifts ----
        p0 = jnp.dot(xext, wext_ref[0], preferred_element_type=f32)   # (N, K)
        p1 = jnp.dot(xext, wext_ref[1], preferred_element_type=f32)
        p2 = jnp.dot(xext, wext_ref[2], preferred_element_type=f32)

        def shift_up(p, j):
            # result[r] = p[r + j]; wrapped rows only land in the per-batch
            # boundary rows (s >= S) which are dropped below.
            return jnp.concatenate([p[j:, :], p[:j, :]], axis=0)

        conv = p0 + shift_up(p1, 1) + shift_up(p2, 2) + bc_ref[...]   # (N, K)
        rc = jnp.maximum(conv, 0.0)                                    # relu

        # ---- predict head: faithful view(K,-1).transpose(0,1) @ W + b ----
        # slab[b*K + k, s] = rc[b*SEQ + s, k]  == NCHW-flat conv output rows.
        slab = jnp.concatenate(
            [rc[b * SEQ:b * SEQ + S, :].T for b in range(B)], axis=0)  # (B*K, S)
        # pred[q, s] = bias + sum_i w[i] * slab[i*B + q, s]
        acc = jnp.zeros((B, S), f32)
        for i in range(K):
            acc = acc + wp_ref[:, i:i + 1] * slab[i * B:(i + 1) * B, :]
        pred_ref[...] = acc + bp_ref[...]

    return kernel


@functools.partial(jax.jit, static_argnums=(3, 4, 5, 6))
def net_forward(params, x, condition, batch, sequence_len, n_feature, embedding_dim):
    del n_feature  # x.shape[1] already carries it
    N, F = x.shape
    E = embedding_dim
    D = F + E
    S = sequence_len - 2
    K = CONV_K
    B = batch
    f32 = jnp.float32

    # ---- parameter-only preprocessing (no activation HBM traffic) ----
    w1t = params["enc_w1"].T.astype(f32); b1 = params["enc_b1"][None, :].astype(f32)
    w2t = params["enc_w2"].T.astype(f32); b2 = params["enc_b2"][None, :].astype(f32)
    w3t = params["dec_w1"].T.astype(f32); b3 = params["dec_b1"][None, :].astype(f32)
    w4t = params["dec_w2"].T.astype(f32); b4 = params["dec_b2"][None, :].astype(f32)

    # conv weights as (3, D, K); fold the embedding table into the first E rows
    # so the kernel contracts a single (N, 8+F) operand per tap.
    wct3 = jnp.transpose(params["conv_w"].reshape(K, 3, D), (1, 2, 0)).astype(f32)
    emb_part = jnp.einsum("ve,jek->jvk", params["emb"].astype(f32), wct3[:, :E, :])
    wext = jnp.concatenate([emb_part, wct3[:, E:, :]], axis=1)      # (3, 8+F, K)
    bc = params["conv_b"][None, :].astype(f32)                      # (1, K)
    wp = params["pred_w"].reshape(1, K).astype(f32)                 # (1, K)
    bp = params["pred_b"].reshape(1, 1).astype(f32)                 # (1, 1)

    cond2d = condition.reshape(N, 1).astype(jnp.int32)

    args = (x.astype(f32), cond2d, w1t, b1, w2t, b2, w3t, b3, w4t, b4,
            wext, bc, wp, bp)
    out_shape = (jax.ShapeDtypeStruct((N, ENC_OUT + DEC_OUT), f32),
                 jax.ShapeDtypeStruct((B, S), f32))

    kernel = _make_fused_kernel(B, sequence_len)
    encdec, pred_bs = pl.pallas_call(
        kernel,
        out_shape=out_shape,
        grid=(1,),
        in_specs=[_full_spec(a.shape) for a in args],
        out_specs=tuple(_full_spec(o.shape) for o in out_shape),
        compiler_params=pltpu.CompilerParams(
            dimension_semantics=("arbitrary",)),
    )(*args)

    encoded = encdec[:, :ENC_OUT]
    decoded = encdec[:, ENC_OUT:]
    return encoded, decoded, pred_bs.reshape(-1)


# ---------------- pure-JAX reference (for sanity check) ----------------

def reference_forward(params, x, condition, batch, sequence_len, n_feature, embedding_dim):
    D = n_feature + embedding_dim
    K = CONV_K
    h = jnp.tanh(x @ params["enc_w1"].T + params["enc_b1"])
    enc = h @ params["enc_w2"].T + params["enc_b2"]
    g = jnp.tanh(enc @ params["dec_w1"].T + params["dec_b1"])
    dec = jax.nn.sigmoid(g @ params["dec_w2"].T + params["dec_b2"])
    embeds = params["emb"][condition]
    xcat = jnp.concatenate([embeds, x], axis=1).reshape(batch, 1, sequence_len, D)
    out = jax.lax.conv_general_dilated(
        xcat, params["conv_w"], window_strides=(1, 1), padding="VALID",
        dimension_numbers=("NCHW", "OIHW", "NCHW"),
        precision=jax.lax.Precision.HIGHEST)
    out = jax.nn.relu(out + params["conv_b"][None, :, None, None])  # (B, K, S, 1)
    cnn = out.reshape(K, -1).T
    pred = cnn @ params["pred_w"].T + params["pred_b"]
    return enc, dec, pred.reshape(-1)


# ---------------- deterministic parameter init ----------------

def init_params(key, n_feature, embedding_dim):
    D = n_feature + embedding_dim
    K = CONV_K
    ks = jax.random.split(key, 8)

    def lin(k, out_f, in_f):
        kw, kb = jax.random.split(k)
        bound = 1.0 / jnp.sqrt(jnp.float32(in_f))
        w = jax.random.uniform(kw, (out_f, in_f), jnp.float32, -bound, bound)
        b = jax.random.uniform(kb, (out_f,), jnp.float32, -bound, bound)
        return w, b

    p = {}
    p["enc_w1"], p["enc_b1"] = lin(ks[0], 6, 8)
    p["enc_w2"], p["enc_b2"] = lin(ks[1], 4, 6)
    p["dec_w1"], p["dec_b1"] = lin(ks[2], 6, 4)
    p["dec_w2"], p["dec_b2"] = lin(ks[3], 8, 6)
    p["emb"] = jax.random.normal(ks[4], (EMB_ROWS, embedding_dim), jnp.float32)
    bound = 1.0 / jnp.sqrt(jnp.float32(3 * D))
    p["conv_w"] = jax.random.uniform(ks[5], (K, 1, 3, D), jnp.float32, -bound, bound)
    p["conv_b"] = jax.random.uniform(ks[6], (K,), jnp.float32, -bound, bound)
    p["pred_w"], p["pred_b"] = lin(ks[7], 1, K)
    return p


if __name__ == "__main__":
    batch, sequence_len = 2, 8
    n_feature, embedding_dim, n_hidden = 8, 4, 32  # n_hidden unused in forward

    key = jax.random.PRNGKey(0)
    kp, kx, kc = jax.random.split(key, 3)
    params = init_params(kp, n_feature, embedding_dim)

    N = batch * sequence_len
    x = jax.random.normal(kx, (N, n_feature), jnp.float32)
    condition = jax.random.randint(kc, (N,), 0, EMB_ROWS, jnp.int32)

    encoded, decoded, pred = net_forward(params, x, condition,
                                         batch, sequence_len, n_feature, embedding_dim)
    jax.block_until_ready((encoded, decoded, pred))

    enc_r, dec_r, pred_r = reference_forward(params, x, condition,
                                             batch, sequence_len, n_feature, embedding_dim)
    assert encoded.shape == (N, ENC_OUT) and decoded.shape == (N, DEC_OUT)
    assert pred.shape == (batch * (sequence_len - 2),)
    assert jnp.allclose(encoded, enc_r, atol=1e-3, rtol=1e-3)
    assert jnp.allclose(decoded, dec_r, atol=1e-3, rtol=1e-3)
    assert jnp.allclose(pred, pred_r, atol=1e-3, rtol=1e-3)

    print("KERNEL_OK")
</pallas_src>

<mosaic_0001>
module attributes {stable_mosaic.version = 11 : i64} {
  func.func @kernel(%arg0: i32, %arg1: memref<16x8xf32, #tpu.memory_space<vmem>>, %arg2: memref<16x1xi32, #tpu.memory_space<vmem>>, %arg3: memref<8x6xf32, #tpu.memory_space<vmem>>, %arg4: memref<1x6xf32, #tpu.memory_space<vmem>>, %arg5: memref<6x4xf32, #tpu.memory_space<vmem>>, %arg6: memref<1x4xf32, #tpu.memory_space<vmem>>, %arg7: memref<4x6xf32, #tpu.memory_space<vmem>>, %arg8: memref<1x6xf32, #tpu.memory_space<vmem>>, %arg9: memref<6x8xf32, #tpu.memory_space<vmem>>, %arg10: memref<1x8xf32, #tpu.memory_space<vmem>>, %arg11: memref<3x16x10xf32, #tpu.memory_space<vmem>>, %arg12: memref<1x10xf32, #tpu.memory_space<vmem>>, %arg13: memref<1x10xf32, #tpu.memory_space<vmem>>, %arg14: memref<1x1xf32, #tpu.memory_space<vmem>>, %arg15: memref<16x12xf32, #tpu.memory_space<vmem>>, %arg16: memref<2x6xf32, #tpu.memory_space<vmem>>) attributes {dimension_semantics = [#tpu.dimension_semantics<arbitrary>], iteration_bounds = array<i64: 1>, scalar_prefetch = 0 : i64, scratch_operands = 0 : i64, tpu.core_type = #tpu.core_type<tc>, window_params = [{pipeline_mode = #tpu.pipeline_mode<synchronous>, transform_indices = @transform_0, window_bounds = array<i64: 16, 8>}, {pipeline_mode = #tpu.pipeline_mode<synchronous>, transform_indices = @transform_1, window_bounds = array<i64: 16, 1>}, {pipeline_mode = #tpu.pipeline_mode<synchronous>, transform_indices = @transform_2, window_bounds = array<i64: 8, 6>}, {pipeline_mode = #tpu.pipeline_mode<synchronous>, transform_indices = @transform_3, window_bounds = array<i64: 1, 6>}, {pipeline_mode = #tpu.pipeline_mode<synchronous>, transform_indices = @transform_4, window_bounds = array<i64: 6, 4>}, {pipeline_mode = #tpu.pipeline_mode<synchronous>, transform_indices = @transform_5, window_bounds = array<i64: 1, 4>}, {pipeline_mode = #tpu.pipeline_mode<synchronous>, transform_indices = @transform_6, window_bounds = array<i64: 4, 6>}, {pipeline_mode = #tpu.pipeline_mode<synchronous>, transform_indices = @transform_7, window_bounds = array<i64: 1, 6>}, {pipeline_mode = #tpu.pipeline_mode<synchronous>, transform_indices = @transform_8, window_bounds = array<i64: 6, 8>}, {pipeline_mode = #tpu.pipeline_mode<synchronous>, transform_indices = @transform_9, window_bounds = array<i64: 1, 8>}, {pipeline_mode = #tpu.pipeline_mode<synchronous>, transform_indices = @transform_10, window_bounds = array<i64: 3, 16, 10>}, {pipeline_mode = #tpu.pipeline_mode<synchronous>, transform_indices = @transform_11, window_bounds = array<i64: 1, 10>}, {pipeline_mode = #tpu.pipeline_mode<synchronous>, transform_indices = @transform_12, window_bounds = array<i64: 1, 10>}, {pipeline_mode = #tpu.pipeline_mode<synchronous>, transform_indices = @transform_13, window_bounds = array<i64: 1, 1>}, {pipeline_mode = #tpu.pipeline_mode<synchronous>, transform_indices = @transform_14, window_bounds = array<i64: 16, 12>}, {pipeline_mode = #tpu.pipeline_mode<synchronous>, transform_indices = @transform_15, window_bounds = array<i64: 2, 6>}]} {
    %c0 = arith.constant 0 : index
    %c0_0 = arith.constant 0 : index
    %0 = vector.load %arg1[%c0, %c0_0] : memref<16x8xf32, #tpu.memory_space<vmem>>, vector<16x8xf32>
    %c0_1 = arith.constant 0 : index
    %c0_2 = arith.constant 0 : index
    %1 = vector.load %arg3[%c0_1, %c0_2] : memref<8x6xf32, #tpu.memory_space<vmem>>, vector<8x6xf32>
    %cst = arith.constant dense<0.000000e+00> : vector<16x6xf32>
    %2 = tpu.matmul %0, %1, %cst {dimension_numbers = #tpu.dot_dimension_numbers<[1], [0], [0], [1], [0, 0, 1, 1], [], []>, precision = #tpu.contract_precision<fp32>} : vector<16x8xf32>, vector<8x6xf32>, vector<16x6xf32> -> vector<16x6xf32>
    %c0_3 = arith.constant 0 : index
    %c0_4 = arith.constant 0 : index
    %3 = vector.load %arg4[%c0_3, %c0_4] : memref<1x6xf32, #tpu.memory_space<vmem>>, vector<1x6xf32>
    %4 = vector.broadcast %3 : vector<1x6xf32> to vector<16x6xf32>
    %5 = arith.addf %2, %4 : vector<16x6xf32>
    %6 = math.tanh %5 : vector<16x6xf32>
    %c0_5 = arith.constant 0 : index
    %c0_6 = arith.constant 0 : index
    %7 = vector.load %arg5[%c0_5, %c0_6] : memref<6x4xf32, #tpu.memory_space<vmem>>, vector<6x4xf32>
    %cst_7 = arith.constant dense<0.000000e+00> : vector<16x4xf32>
    %8 = tpu.matmul %6, %7, %cst_7 {dimension_numbers = #tpu.dot_dimension_numbers<[1], [0], [0], [1], [0, 0, 1, 1], [], []>, precision = #tpu.contract_precision<fp32>} : vector<16x6xf32>, vector<6x4xf32>, vector<16x4xf32> -> vector<16x4xf32>
    %c0_8 = arith.constant 0 : index
    %c0_9 = arith.constant 0 : index
    %9 = vector.load %arg6[%c0_8, %c0_9] : memref<1x4xf32, #tpu.memory_space<vmem>>, vector<1x4xf32>
    %10 = vector.broadcast %9 : vector<1x4xf32> to vector<16x4xf32>
    %11 = arith.addf %8, %10 : vector<16x4xf32>
    %c0_10 = arith.constant 0 : index
    %c0_11 = arith.constant 0 : index
    %12 = vector.load %arg7[%c0_10, %c0_11] : memref<4x6xf32, #tpu.memory_space<vmem>>, vector<4x6xf32>
    %cst_12 = arith.constant dense<0.000000e+00> : vector<16x6xf32>
    %13 = tpu.matmul %11, %12, %cst_12 {dimension_numbers = #tpu.dot_dimension_numbers<[1], [0], [0], [1], [0, 0, 1, 1], [], []>, precision = #tpu.contract_precision<fp32>} : vector<16x4xf32>, vector<4x6xf32>, vector<16x6xf32> -> vector<16x6xf32>
    %c0_13 = arith.constant 0 : index
    %c0_14 = arith.constant 0 : index
    %14 = vector.load %arg8[%c0_13, %c0_14] : memref<1x6xf32, #tpu.memory_space<vmem>>, vector<1x6xf32>
    %15 = vector.broadcast %14 : vector<1x6xf32> to vector<16x6xf32>
    %16 = arith.addf %13, %15 : vector<16x6xf32>
    %17 = math.tanh %16 : vector<16x6xf32>
    %c0_15 = arith.constant 0 : index
    %c0_16 = arith.constant 0 : index
    %18 = vector.load %arg9[%c0_15, %c0_16] : memref<6x8xf32, #tpu.memory_space<vmem>>, vector<6x8xf32>
    %cst_17 = arith.constant dense<0.000000e+00> : vector<16x8xf32>
    %19 = tpu.matmul %17, %18, %cst_17 {dimension_numbers = #tpu.dot_dimension_numbers<[1], [0], [0], [1], [0, 0, 1, 1], [], []>, precision = #tpu.contract_precision<fp32>} : vector<16x6xf32>, vector<6x8xf32>, vector<16x8xf32> -> vector<16x8xf32>
    %c0_18 = arith.constant 0 : index
    %c0_19 = arith.constant 0 : index
    %20 = vector.load %arg10[%c0_18, %c0_19] : memref<1x8xf32, #tpu.memory_space<vmem>>, vector<1x8xf32>
    %21 = vector.broadcast %20 : vector<1x8xf32> to vector<16x8xf32>
    %22 = arith.addf %19, %21 : vector<16x8xf32>
    %23 = arith.negf %22 : vector<16x8xf32>
    %24 = math.exp %23 : vector<16x8xf32>
    %cst_20 = arith.constant 1.000000e+00 : f32
    %25 = vector.broadcast %cst_20 : f32 to vector<16x8xf32>
    %26 = arith.addf %25, %24 : vector<16x8xf32>
    %27 = arith.divf %25, %26 : vector<16x8xf32>
    %28 = tpu.concatenate %11, %27 in 1 : vector<16x4xf32>, vector<16x8xf32> -> vector<16x12xf32>
    %c0_21 = arith.constant 0 : index
    %c0_22 = arith.constant 0 : index
    %29 = vector.load %arg15[%c0_21, %c0_22] : memref<16x12xf32, #tpu.memory_space<vmem>>, vector<16x12xf32>
    tpu.vector_store %arg15[%c0_21, %c0_22], %28 {strides = array<i32>} : memref<16x12xf32, #tpu.memory_space<vmem>>, vector<16x12xf32>,
    %30 = tpu.iota {dimensions = array<i32: 1>} : vector<16x8xi32>
    %c0_23 = arith.constant 0 : index
    %c0_24 = arith.constant 0 : index
    %31 = vector.load %arg2[%c0_23, %c0_24] : memref<16x1xi32, #tpu.memory_space<vmem>>, vector<16x1xi32>
    %32 = vector.broadcast %31 : vector<16x1xi32> to vector<16x8xi32>
    %33 = arith.cmpi eq, %30, %32 : vector<16x8xi32>
    %34 = arith.extui %33 : vector<16x8xi1> to vector<16x8xi32>
    %35 = arith.sitofp %34 : vector<16x8xi32> to vector<16x8xf32>
    %36 = tpu.concatenate %35, %0 in 1 : vector<16x8xf32>, vector<16x8xf32> -> vector<16x16xf32>
    %c0_25 = arith.constant 0 : index
    %c0_26 = arith.constant 0 : index
    %c0_27 = arith.constant 0 : index
    %37 = vector.load %arg11[%c0_25, %c0_26, %c0_27] : memref<3x16x10xf32, #tpu.memory_space<vmem>>, vector<1x16x10xf32>
    %38 = vector.shape_cast %37 : vector<1x16x10xf32> to vector<16x10xf32>
    %cst_28 = arith.constant dense<0.000000e+00> : vector<16x10xf32>
    %39 = tpu.matmul %36, %38, %cst_28 {dimension_numbers = #tpu.dot_dimension_numbers<[1], [0], [0], [1], [0, 0, 1, 1], [], []>, precision = #tpu.contract_precision<fp32>} : vector<16x16xf32>, vector<16x10xf32>, vector<16x10xf32> -> vector<16x10xf32>
    %c1 = arith.constant 1 : index
    %c0_29 = arith.constant 0 : index
    %c0_30 = arith.constant 0 : index
    %40 = vector.load %arg11[%c1, %c0_29, %c0_30] : memref<3x16x10xf32, #tpu.memory_space<vmem>>, vector<1x16x10xf32>
    %41 = vector.shape_cast %40 : vector<1x16x10xf32> to vector<16x10xf32>
    %cst_31 = arith.constant dense<0.000000e+00> : vector<16x10xf32>
    %42 = tpu.matmul %36, %41, %cst_31 {dimension_numbers = #tpu.dot_dimension_numbers<[1], [0], [0], [1], [0, 0, 1, 1], [], []>, precision = #tpu.contract_precision<fp32>} : vector<16x16xf32>, vector<16x10xf32>, vector<16x10xf32> -> vector<16x10xf32>
    %c2 = arith.constant 2 : index
    %c0_32 = arith.constant 0 : index
    %c0_33 = arith.constant 0 : index
    %43 = vector.load %arg11[%c2, %c0_32, %c0_33] : memref<3x16x10xf32, #tpu.memory_space<vmem>>, vector<1x16x10xf32>
    %44 = vector.shape_cast %43 : vector<1x16x10xf32> to vector<16x10xf32>
    %cst_34 = arith.constant dense<0.000000e+00> : vector<16x10xf32>
    %45 = tpu.matmul %36, %44, %cst_34 {dimension_numbers = #tpu.dot_dimension_numbers<[1], [0], [0], [1], [0, 0, 1, 1], [], []>, precision = #tpu.contract_precision<fp32>} : vector<16x16xf32>, vector<16x10xf32>, vector<16x10xf32> -> vector<16x10xf32>
    %46 = vector.extract_strided_slice %42 {offsets = [1, 0], sizes = [15, 10], strides = [1, 1]} : vector<16x10xf32> to vector<15x10xf32>
    %47 = vector.extract_strided_slice %42 {offsets = [0, 0], sizes = [1, 10], strides = [1, 1]} : vector<16x10xf32> to vector<1x10xf32>
    %48 = tpu.concatenate %46, %47 in 0 : vector<15x10xf32>, vector<1x10xf32> -> vector<16x10xf32>
    %49 = arith.addf %39, %48 : vector<16x10xf32>
    %50 = vector.extract_strided_slice %45 {offsets = [2, 0], sizes = [14, 10], strides = [1, 1]} : vector<16x10xf32> to vector<14x10xf32>
    %51 = vector.extract_strided_slice %45 {offsets = [0, 0], sizes = [2, 10], strides = [1, 1]} : vector<16x10xf32> to vector<2x10xf32>
    %52 = tpu.concatenate %50, %51 in 0 : vector<14x10xf32>, vector<2x10xf32> -> vector<16x10xf32>
    %53 = arith.addf %49, %52 : vector<16x10xf32>
    %c0_35 = arith.constant 0 : index
    %c0_36 = arith.constant 0 : index
    %54 = vector.load %arg12[%c0_35, %c0_36] : memref<1x10xf32, #tpu.memory_space<vmem>>, vector<1x10xf32>
    %55 = vector.broadcast %54 : vector<1x10xf32> to vector<16x10xf32>
    %56 = arith.addf %53, %55 : vector<16x10xf32>
    %cst_37 = arith.constant 0.000000e+00 : f32
    %57 = vector.broadcast %cst_37 : f32 to vector<16x10xf32>
    %58 = arith.maximumf %56, %57 : vector<16x10xf32>
    %59 = vector.extract_strided_slice %58 {offsets = [0, 0], sizes = [6, 10], strides = [1, 1]} : vector<16x10xf32> to vector<6x10xf32>
    %60 = tpu.transpose %59, [1, 0] : vector<6x10xf32> -> vector<10x6xf32>
    %61 = vector.extract_strided_slice %58 {offsets = [8, 0], sizes = [6, 10], strides = [1, 1]} : vector<16x10xf32> to vector<6x10xf32>
    %62 = tpu.transpose %61, [1, 0] : vector<6x10xf32> -> vector<10x6xf32>
    %63 = tpu.concatenate %60, %62 in 0 : vector<10x6xf32>, vector<10x6xf32> -> vector<20x6xf32>
    %cst_38 = arith.constant 0.000000e+00 : f32
    %64 = vector.broadcast %cst_38 : f32 to vector<2x6xf32>
    %c0_39 = arith.constant 0 : index
    %c0_40 = arith.constant 0 : index
    %65 = vector.load %arg13[%c0_39, %c0_40] : memref<1x10xf32, #tpu.memory_space<vmem>>, vector<1x1xf32>
    %66 = vector.extract_strided_slice %63 {offsets = [0, 0], sizes = [2, 6], strides = [1, 1]} : vector<20x6xf32> to vector<2x6xf32>
    %67 = vector.broadcast %65 : vector<1x1xf32> to vector<2x6xf32>
    %68 = arith.mulf %67, %66 : vector<2x6xf32>
    %69 = arith.addf %64, %68 : vector<2x6xf32>
    %c0_41 = arith.constant 0 : index
    %c1_42 = arith.constant 1 : index
    %70 = vector.load %arg13[%c0_41, %c1_42] : memref<1x10xf32, #tpu.memory_space<vmem>>, vector<1x1xf32>
    %71 = vector.extract_strided_slice %63 {offsets = [2, 0], sizes = [2, 6], strides = [1, 1]} : vector<20x6xf32> to vector<2x6xf32>
    %72 = vector.broadcast %70 : vector<1x1xf32> to vector<2x6xf32>
    %73 = arith.mulf %72, %71 : vector<2x6xf32>
    %74 = arith.addf %69, %73 : vector<2x6xf32>
    %c0_43 = arith.constant 0 : index
    %c2_44 = arith.constant 2 : index
    %75 = vector.load %arg13[%c0_43, %c2_44] : memref<1x10xf32, #tpu.memory_space<vmem>>, vector<1x1xf32>
    %76 = vector.extract_strided_slice %63 {offsets = [4, 0], sizes = [2, 6], strides = [1, 1]} : vector<20x6xf32> to vector<2x6xf32>
    %77 = vector.broadcast %75 : vector<1x1xf32> to vector<2x6xf32>
    %78 = arith.mulf %77, %76 : vector<2x6xf32>
    %79 = arith.addf %74, %78 : vector<2x6xf32>
    %c0_45 = arith.constant 0 : index
    %c3 = arith.constant 3 : index
    %80 = vector.load %arg13[%c0_45, %c3] : memref<1x10xf32, #tpu.memory_space<vmem>>, vector<1x1xf32>
    %81 = vector.extract_strided_slice %63 {offsets = [6, 0], sizes = [2, 6], strides = [1, 1]} : vector<20x6xf32> to vector<2x6xf32>
    %82 = vector.broadcast %80 : vector<1x1xf32> to vector<2x6xf32>
    %83 = arith.mulf %82, %81 : vector<2x6xf32>
    %84 = arith.addf %79, %83 : vector<2x6xf32>
    %c0_46 = arith.constant 0 : index
    %c4 = arith.constant 4 : index
    %85 = vector.load %arg13[%c0_46, %c4] : memref<1x10xf32, #tpu.memory_space<vmem>>, vector<1x1xf32>
    %86 = vector.extract_strided_slice %63 {offsets = [8, 0], sizes = [2, 6], strides = [1, 1]} : vector<20x6xf32> to vector<2x6xf32>
    %87 = vector.broadcast %85 : vector<1x1xf32> to vector<2x6xf32>
    %88 = arith.mulf %87, %86 : vector<2x6xf32>
    %89 = arith.addf %84, %88 : vector<2x6xf32>
    %c0_47 = arith.constant 0 : index
    %c5 = arith.constant 5 : index
    %90 = vector.load %arg13[%c0_47, %c5] : memref<1x10xf32, #tpu.memory_space<vmem>>, vector<1x1xf32>
    %91 = vector.extract_strided_slice %63 {offsets = [10, 0], sizes = [2, 6], strides = [1, 1]} : vector<20x6xf32> to vector<2x6xf32>
    %92 = vector.broadcast %90 : vector<1x1xf32> to vector<2x6xf32>
    %93 = arith.mulf %92, %91 : vector<2x6xf32>
    %94 = arith.addf %89, %93 : vector<2x6xf32>
    %c0_48 = arith.constant 0 : index
    %c6 = arith.constant 6 : index
    %95 = vector.load %arg13[%c0_48, %c6] : memref<1x10xf32, #tpu.memory_space<vmem>>, vector<1x1xf32>
    %96 = vector.extract_strided_slice %63 {offsets = [12, 0], sizes = [2, 6], strides = [1, 1]} : vector<20x6xf32> to vector<2x6xf32>
    %97 = vector.broadcast %95 : vector<1x1xf32> to vector<2x6xf32>
    %98 = arith.mulf %97, %96 : vector<2x6xf32>
    %99 = arith.addf %94, %98 : vector<2x6xf32>
    %c0_49 = arith.constant 0 : index
    %c7 = arith.constant 7 : index
    %100 = vector.load %arg13[%c0_49, %c7] : memref<1x10xf32, #tpu.memory_space<vmem>>, vector<1x1xf32>
    %101 = vector.extract_strided_slice %63 {offsets = [14, 0], sizes = [2, 6], strides = [1, 1]} : vector<20x6xf32> to vector<2x6xf32>
    %102 = vector.broadcast %100 : vector<1x1xf32> to vector<2x6xf32>
    %103 = arith.mulf %102, %101 : vector<2x6xf32>
    %104 = arith.addf %99, %103 : vector<2x6xf32>
    %c0_50 = arith.constant 0 : index
    %c8 = arith.constant 8 : index
    %105 = vector.load %arg13[%c0_50, %c8] : memref<1x10xf32, #tpu.memory_space<vmem>>, vector<1x1xf32>
    %106 = vector.extract_strided_slice %63 {offsets = [16, 0], sizes = [2, 6], strides = [1, 1]} : vector<20x6xf32> to vector<2x6xf32>
    %107 = vector.broadcast %105 : vector<1x1xf32> to vector<2x6xf32>
    %108 = arith.mulf %107, %106 : vector<2x6xf32>
    %109 = arith.addf %104, %108 : vector<2x6xf32>
    %c0_51 = arith.constant 0 : index
    %c9 = arith.constant 9 : index
    %110 = vector.load %arg13[%c0_51, %c9] : memref<1x10xf32, #tpu.memory_space<vmem>>, vector<1x1xf32>
    %111 = vector.extract_strided_slice %63 {offsets = [18, 0], sizes = [2, 6], strides = [1, 1]} : vector<20x6xf32> to vector<2x6xf32>
    %112 = vector.broadcast %110 : vector<1x1xf32> to vector<2x6xf32>
    %113 = arith.mulf %112, %111 : vector<2x6xf32>
    %114 = arith.addf %109, %113 : vector<2x6xf32>
    %c0_52 = arith.constant 0 : index
    %c0_53 = arith.constant 0 : index
    %115 = vector.load %arg14[%c0_52, %c0_53] : memref<1x1xf32, #tpu.memory_space<vmem>>, vector<1x1xf32>
    %116 = vector.broadcast %115 : vector<1x1xf32> to vector<2x6xf32>
    %117 = arith.addf %114, %116 : vector<2x6xf32>
    %c0_54 = arith.constant 0 : index
    %c0_55 = arith.constant 0 : index
    %118 = vector.load %arg16[%c0_54, %c0_55] : memref<2x6xf32, #tpu.memory_space<vmem>>, vector<2x6xf32>
    tpu.vector_store %arg16[%c0_54, %c0_55], %117 {strides = array<i32>} : memref<2x6xf32, #tpu.memory_space<vmem>>, vector<2x6xf32>,
    return
  }
  func.func @transform_0(%arg0: i32) -> (i32, i32) {
    %c0_i32 = arith.constant 0 : i32
    %c0_i32_0 = arith.constant 0 : i32
    %c0_i32_1 = arith.constant 0 : i32
    return %c0_i32, %c0_i32_0 : i32, i32
  }
  func.func @transform_1(%arg0: i32) -> (i32, i32) {
    %c0_i32 = arith.constant 0 : i32
    %c0_i32_0 = arith.constant 0 : i32
    %c0_i32_1 = arith.constant 0 : i32
    return %c0_i32, %c0_i32_0 : i32, i32
  }
  func.func @transform_2(%arg0: i32) -> (i32, i32) {
    %c0_i32 = arith.constant 0 : i32
    %c0_i32_0 = arith.constant 0 : i32
    %c0_i32_1 = arith.constant 0 : i32
    return %c0_i32, %c0_i32_0 : i32, i32
  }
  func.func @transform_3(%arg0: i32) -> (i32, i32) {
    %c0_i32 = arith.constant 0 : i32
    %c0_i32_0 = arith.constant 0 : i32
    %c0_i32_1 = arith.constant 0 : i32
    return %c0_i32, %c0_i32_0 : i32, i32
  }
  func.func @transform_4(%arg0: i32) -> (i32, i32) {
    %c0_i32 = arith.constant 0 : i32
    %c0_i32_0 = arith.constant 0 : i32
    %c0_i32_1 = arith.constant 0 : i32
    return %c0_i32, %c0_i32_0 : i32, i32
  }
  func.func @transform_5(%arg0: i32) -> (i32, i32) {
    %c0_i32 = arith.constant 0 : i32
    %c0_i32_0 = arith.constant 0 : i32
    %c0_i32_1 = arith.constant 0 : i32
    return %c0_i32, %c0_i32_0 : i32, i32
  }
  func.func @transform_6(%arg0: i32) -> (i32, i32) {
    %c0_i32 = arith.constant 0 : i32
    %c0_i32_0 = arith.constant 0 : i32
    %c0_i32_1 = arith.constant 0 : i32
    return %c0_i32, %c0_i32_0 : i32, i32
  }
  func.func @transform_7(%arg0: i32) -> (i32, i32) {
    %c0_i32 = arith.constant 0 : i32
    %c0_i32_0 = arith.constant 0 : i32
    %c0_i32_1 = arith.constant 0 : i32
    return %c0_i32, %c0_i32_0 : i32, i32
  }
  func.func @transform_8(%arg0: i32) -> (i32, i32) {
    %c0_i32 = arith.constant 0 : i32
    %c0_i32_0 = arith.constant 0 : i32
    %c0_i32_1 = arith.constant 0 : i32
    return %c0_i32, %c0_i32_0 : i32, i32
  }
  func.func @transform_9(%arg0: i32) -> (i32, i32) {
    %c0_i32 = arith.constant 0 : i32
    %c0_i32_0 = arith.constant 0 : i32
    %c0_i32_1 = arith.constant 0 : i32
    return %c0_i32, %c0_i32_0 : i32, i32
  }
  func.func @transform_10(%arg0: i32) -> (i32, i32, i32) {
    %c0_i32 = arith.constant 0 : i32
    %c0_i32_0 = arith.constant 0 : i32
    %c0_i32_1 = arith.constant 0 : i32
    %c0_i32_2 = arith.constant 0 : i32
    return %c0_i32, %c0_i32_0, %c0_i32_1 : i32, i32, i32
  }
  func.func @transform_11(%arg0: i32) -> (i32, i32) {
    %c0_i32 = arith.constant 0 : i32
    %c0_i32_0 = arith.constant 0 : i32
    %c0_i32_1 = arith.constant 0 : i32
    return %c0_i32, %c0_i32_0 : i32, i32
  }
  func.func @transform_12(%arg0: i32) -> (i32, i32) {
    %c0_i32 = arith.constant 0 : i32
    %c0_i32_0 = arith.constant 0 : i32
    %c0_i32_1 = arith.constant 0 : i32
    return %c0_i32, %c0_i32_0 : i32, i32
  }
  func.func @transform_13(%arg0: i32) -> (i32, i32) {
    %c0_i32 = arith.constant 0 : i32
    %c0_i32_0 = arith.constant 0 : i32
    %c0_i32_1 = arith.constant 0 : i32
    return %c0_i32, %c0_i32_0 : i32, i32
  }
  func.func @transform_14(%arg0: i32) -> (i32, i32) {
    %c0_i32 = arith.constant 0 : i32
    %c0_i32_0 = arith.constant 0 : i32
    %c0_i32_1 = arith.constant 0 : i32
    return %c0_i32, %c0_i32_0 : i32, i32
  }
  func.func @transform_15(%arg0: i32) -> (i32, i32) {
    %c0_i32 = arith.constant 0 : i32
    %c0_i32_0 = arith.constant 0 : i32
    %c0_i32_1 = arith.constant 0 : i32
    return %c0_i32, %c0_i32_0 : i32, i32
  }
}

</mosaic_0001>

<bundles_post_ra>
// kernel: net_forward.1
= control target key start
LH: loop header
LB: loop body
LE: loop exit
PB: predicated region body
PF: predicated region fallthrough
CT: control target
= control target key end

     0   :  { %vm61_vm0 = vcmask 64512   ;;  %vm574_vm1 = vcmask 1045504   ;;  %vm567_vm2 = vcmask 48128   ;;  %vm1082_vm3 = vcmask 1043456   ;;  %s4766_s2 = inlined_call_operand.vmem [shape: f32[8,6], index: 2, kind: input, shape index: {}]   ;;  %s4767_s0 = inlined_call_operand.vmem [shape: f32[16,8], index: 0, kind: input, shape index: {}]   ;;  %s4768_s4 = inlined_call_operand.vmem [shape: f32[6,4], index: 4, kind: input, shape index: {}]   ;;  %s4769_s3 = inlined_call_operand.vmem [shape: f32[1,6], index: 3, kind: input, shape index: {}]   ;;  %s4770_s6 = inlined_call_operand.vmem [shape: f32[4,6], index: 6, kind: input, shape index: {}]   ;;  %s4771_s1 = inlined_call_operand.vmem [shape: s32[16,1], index: 1, kind: input, shape index: {}]   ;;  %s4772_s5 = inlined_call_operand.vmem [shape: f32[1,4], index: 5, kind: input, shape index: {}]   ;;  %s4773_s10 = inlined_call_operand.vmem [shape: f32[3,16,10], index: 10, kind: input, shape index: {}]   ;;  %s4774_s8 = inlined_call_operand.vmem [shape: f32[6,8], index: 8, kind: input, shape index: {}]   ;;  %s4775_s12 = inlined_call_operand.vmem [shape: f32[1,10], index: 12, kind: input, shape index: {}]   ;;  %s4776_s7 = inlined_call_operand.vmem [shape: f32[1,6], index: 7, kind: input, shape index: {}]   ;;  %s4777_s13 = inlined_call_operand.<no memory space> [shape: f32[1,1], index: 13, kind: input, shape index: {}]   ;;  %s4778_s9 = inlined_call_operand.vmem [shape: f32[1,8], index: 9, kind: input, shape index: {}]   ;;  %s4779_s11 = inlined_call_operand.vmem [shape: f32[1,10], index: 11, kind: input, shape index: {}]   ;;  %s4780_s14 = inlined_call_operand.vmem [shape: f32[16,12], index: 14, kind: output, shape index: {0}]   ;;  %s4781_s15 = inlined_call_operand.vmem [shape: f32[2,6], index: 15, kind: output, shape index: {1}]  }
   0x1   :  { %v53_v0 = vld [vmem:[%s4766_s2] sm:$0xff]  ;;  %v4569_v2 = vld [vmem:[%s4767_s0 + $0x8] sm:$0xff]  ;;  %v4465_v57 = vmov 0   ;;  %vm1075_vm4 = vcmask 31744   ;;  %vm2137_vm6 = vcmask 130048   ;;  %vm3153_vm8 = vcmask 1046528  }
   0x2   :  { %v4564_v1 = vld [vmem:[%s4767_s0] sm:$0xff]  ;;  %v69_v3 = vand.u32 4294901760, %v53_v0  ;;  %v66_v5 = vsel %vm61_vm0, %v4569_v2, 0  ;;  %4436 = vset.pattern.permute.xlu0 %v4465_v57  ;;  %4438 = vset.pattern.permute.xlu1 %v4465_v57  ;;  %v2111_v59 = vld [vmem:[%s4771_s1 + $0x8] sm:$0xff]  ;;  %vm2105_vm9 = vcmask 97280   ;;  %vm3751_vm10 = vcmask 1041408  }
   0x3   :  { %v63_v4 = vsel %vm61_vm0, %v4564_v1, 0  ;;  %v144_v7 = vand.u32 4294901760, %v66_v5  ;;  %v559_v20 = vld [vmem:[%s4768_s4] sm:$0x3f]  ;;  %vm3856_vm11 = vcmask 41984  }
   0x4   :  { %v134_v6 = vand.u32 4294901760, %v63_v4  ;;  %4040 = vmatprep.subr.mxu0 %v69_v3  ;;  %4025 = vmatprep.subr.mxu1 %v69_v3  ;;  %v156_v8 = vsub.f32 %v53_v0, %v69_v3  ;;  %v576_v21 = vsel %vm574_vm1, %v559_v20, 0  ;;  %v3866_v29 = vld [vmem:[%s4769_s3] ss:$0 sm:$0xff] }
   0x5   :  { %4041 = vmatpush3.msra.mxu0 %v69_v3  ;;  %v145_v10 = vsub.f32 %v66_v5, %v144_v7  ;;  %4026 = vmatpush3.msra.mxu1 %v69_v3  ;;  %v579_v22 = vand.u32 4294901760, %v576_v21  ;;  %v1067_v50 = vld [vmem:[%s4770_s6] sm:$0xf]  ;;  %s4466_s6 = smov 8  }
   0x6   :  { %v135_v9 = vsub.f32 %v63_v4, %v134_v6  ;;  %v157_v11 = vand.u32 4294901760, %v156_v8  ;;  %v1084_v51 = vsel %vm1082_vm3, %v1067_v50, 0  ;;  %v2110_v58 = vld [vmem:[%s4771_s1] sm:$0xff]  ;;  %2124 = vrot.lane.b32.xlu1 %v4564_v1, %s4466_s6 }
   0x7   :  { %v146_v13 = vand.u32 4294901760, %v145_v10  ;;  %v666_v23 = vsub.f32 %v576_v21, %v579_v22  ;;  %v4587_v52 = vand.u32 4294901760, %v1084_v51  ;;  %2113 = vperm.xlu0 %4436, %v2110_v58   ;;  %v3867_v60 = vld [vmem:[%s4772_s5] ss:$0 sm:$0xff] }
   0x8   :  { %v136_v12 = vand.u32 4294901760, %v135_v9  ;;  %v158_v14 = vsub.f32 %v156_v8, %v157_v11  ;;  %4045 = vmatprep.subr.mxu0 %v157_v11 }
   0x9   :  { %v147_v16 = vsub.f32 %v145_v10, %v146_v13  ;;  %v667_v24 = vand.u32 4294901760, %v666_v23  ;;  %v1174_v53 = vsub.f32 %v1084_v51, %v4587_v52 }
   0xa   :  { %4042 = vmatprep.mubr.f32.mxu0 %v136_v12  ;;  %v137_v15 = vsub.f32 %v135_v9, %v136_v12  ;;  %v159_v17 = vand.u32 4294901760, %v158_v14  ;;  %2126 = vrot.lane.b32.xlu1 %v4569_v2, %s4466_s6  ;;  %v3875_v14 = vld [vmem:[%s4773_s10 + $0x18] sm:$0xff] }
   0xb   :  { %4043 = vmatmul.mubr.f32.vlgmr.msra.gmra.mrb[0].mxu0 %v146_v13  ;;  %v148_v19 = vand.u32 4294901760, %v147_v16  ;;  %v668_v25 = vsub.f32 %v666_v23, %v667_v24  ;;  %v1175_v54 = vand.u32 4294901760, %v1174_v53  ;;  %2116 = vperm.xlu0 %4436, %v2111_v59   ;;  %v3874_v13 = vld [vmem:[%s4773_s10 + $0x10] sm:$0xff]  ;;  %v2148_v16 = vand.u32 4294901760, %v3875_v14 }
   0xc   :  { %v138_v18 = vand.u32 4294901760, %v137_v15  ;;  %4046 = vmatpush3.msra.mxu0 %v157_v11  ;;  %4047 = vmatprep.mubr.f32.mxu0 %v134_v6  ;;  %v2145_v15 = vand.u32 4294901760, %v3874_v13 }
   0xd   :  { %4030 = vmatprep.subr.mxu1 %v159_v17  ;;  %4050 = vmatprep.subr.mxu0 %v69_v3  ;;  %v669_v26 = vand.u32 4294901760, %v668_v25  ;;  %v1176_v55 = vsub.f32 %v1174_v53, %v1175_v54 }
   0xe   :  { %4027 = vmatprep.mubr.f32.mxu1 %v138_v18  ;;  %v2240_v18 = vsub.f32 %v3875_v14, %v2148_v16  ;;  %v4622_v21 = vpack.c.bf16 %v2148_v16, %v2145_v15  ;;  %v4699_v14 = vld [vmem:[%s4775_s12] ss:$0 sm:$0xff]  ;;  %v4469_v16 = vmov 2  }
   0xf   :  { %4028 = vmatmul.mubr.f32.vlgmr.msra.gmra.mrb[0].mxu1 %v148_v19  ;;  %v1177_v56 = vand.u32 4294901760, %v1176_v55  ;;  %3765 = vperm.xlu1 %4438, %v4699_v14  }
  0x10   :  { %4031 = vmatpush3.msra.mxu1 %v159_v17  ;;  %4032 = vmatprep.mubr.f32.mxu1 %v134_v6  ;;  %v2233_v17 = vsub.f32 %v3874_v13, %v2145_v15  ;;  %v2241_v20 = vand.u32 4294901760, %v2240_v18  ;;  %v4468_v15 = vmov 1  }
  0x11   :  { %4035 = vmatprep.subr.mxu1 %v156_v8  ;;  %4437 = vset.pattern.permute.xlu0 %v4468_v15 }
  0x12   :  { %v2234_v19 = vand.u32 4294901760, %v2233_v17  ;;  %v4279_v50 = vpack.c.bf16 %v2240_v18, %v2233_v17  ;;  %3771 = vperm.xlu0 %4437, %v4699_v14  }
  0x13   :  { %4048 = vmatmul.mubr.f32.vlgmr.msra.gmra.mrb[0].mxu0 %v144_v7  ;;  %4439 = vset.pattern.permute.xlu1 %v4469_v16 }
  0x14   :  { %4051 = vmatpush3.msra.mxu0 %v69_v3  ;;  %4052 = vmatprep.mubr.f32.mxu0 %v134_v6  ;;  %v4287_v51 = vpack.c.bf16 %v2241_v20, %v2234_v19 }
  0x15   :  { %4085 = vmatprep.subr.mxu0 %v4587_v52  ;;  %3780 = vperm.xlu1 %4439, %v4699_v14  }
  0x17   :  { %4033 = vmatmul.mubr.f32.vlgmr.msra.gmra.mrb[0].mxu1 %v144_v7 }
  0x18   :  { %4036 = vmatpush3.msra.mxu1 %v156_v8  ;;  %4037 = vmatprep.mubr.f32.mxu1 %v135_v9 }
  0x19   :  { %4055 = vmatprep.subr.mxu1 %v579_v22 }
  0x1b   :  { %4053 = vmatmul.mubr.f32.vlgmr.msra.gmra.mrb[0].mxu0 %v144_v7 }
  0x1c   :  { %4086 = vmatpush3.msra.mxu0 %v4587_v52 }
  0x1d   :  { %4090 = vmatprep.subr.mxu0 %v1177_v56 }
  0x1f   :  { %4038 = vmatmul.mubr.f32.vlgmr.msra.gmra.mrb[0].mxu1 %v145_v10 }
  0x20   :  { %4056 = vmatpush3.msra.mxu1 %v579_v22 }
  0x21   :  { %4060 = vmatprep.subr.mxu1 %v669_v26 }
  0xee   :  { %v4054_v27 = vpop.f32.mrb[0].mxu0 }
  0xef   :  { %v547_v28 = vpop.f32.mrb[1].mxu0 }
  0xf2   :  { %v4039_v30 = vpop.f32.mrb[0].mxu1 }
  0xf3   :  { %v4343_v31 = vadd.f32 %v4039_v30, %v3866_v29  ;;  %v306_v32 = vpop.f32.mrb[1].mxu1  ;;  %v2114_v30 = vpop.permute.xlu0 %2113 }
  0xf4   :  { %v4345_v33 = vadd.f32 %v3866_v29, %v306_v32  ;;  %v2125_v29 = vpop.permute.xlu1 %2124 }
  0xf5   :  { %v4344_v34 = vadd.f32 %v4343_v31, %v4054_v27  ;;  %v4467_v31 = vmov 0.0  }
  0xf6   :  { %v4346_v35 = vadd.f32 %v4345_v33, %v547_v28 }
  0xf7   :  { %4449 = vtanh.f32 %v4344_v34 }
  0xf8   :  { %4451 = vtanh.f32 %v4346_v35  ;;  %v2117_v35 = vpop.permute.xlu0 %2116 }
 0x101   :  { %v4450_v36 = vpop.eup %4449 }
 0x102   :  { %v4452_v37 = vpop.eup %4451  ;;  %v572_v38 = vsel %vm567_vm2, %v4450_v36, 0  ;;  %v2127_v36 = vpop.permute.xlu1 %2126 }
 0x103   :  { %v569_v39 = vsel %vm567_vm2, %v4452_v37, 0  ;;  %v654_v40 = vand.u32 4294901760, %v572_v38 }
 0x104   :  { %v644_v41 = vand.u32 4294901760, %v569_v39 }
 0x105   :  { %v655_v42 = vsub.f32 %v572_v38, %v654_v40 }
 0x106   :  { %v645_v43 = vsub.f32 %v569_v39, %v644_v41 }
 0x107   :  { %v656_v44 = vand.u32 4294901760, %v655_v42 }
 0x108   :  { %v646_v45 = vand.u32 4294901760, %v645_v43 }
 0x109   :  { %v657_v46 = vsub.f32 %v655_v42, %v656_v44 }
 0x10a   :  { %v647_v47 = vsub.f32 %v645_v43, %v646_v45 }
 0x10b   :  { %v658_v49 = vand.u32 4294901760, %v657_v46 }
 0x10c   :  { %v648_v48 = vand.u32 4294901760, %v647_v47 }
 0x10e   :  { %4057 = vmatprep.mubr.f32.mxu1 %v648_v48 }
 0x10f   :  { %4058 = vmatmul.mubr.f32.vlgmr.msra.gmra.mrb[2].mxu1 %v658_v49 }
 0x110   :  { %4061 = vmatpush3.msra.mxu1 %v669_v26  ;;  %4062 = vmatprep.mubr.f32.mxu1 %v644_v41 }
 0x111   :  { %4065 = vmatprep.subr.mxu1 %v666_v23 }
 0x117   :  { %4063 = vmatmul.mubr.f32.vlgmr.msra.gmra.mrb[2].mxu1 %v654_v40 }
 0x118   :  { %4066 = vmatpush3.msra.mxu1 %v666_v23  ;;  %4067 = vmatprep.mubr.f32.mxu1 %v645_v43  ;;  %v2242_v23 = vsub.f32 %v2240_v18, %v2241_v20  ;;  %v4470_v18 = vmov 4  }
 0x119   :  { %4070 = vmatprep.subr.mxu1 %v579_v22  ;;  %4441 = vset.pattern.permute.xlu1 %v4470_v18 }
 0x11a   :  { %v2243_v26 = vand.u32 4294901760, %v2242_v23  ;;  %3798 = vperm.xlu1 %4441, %v4699_v14   ;;  %v4471_v23 = vmov 5  }
 0x11e   :  { %4442 = vset.pattern.permute.xlu1 %v4471_v23 }
 0x11f   :  { %4068 = vmatmul.mubr.f32.vlgmr.msra.gmra.mrb[2].mxu1 %v655_v42  ;;  %3804 = vperm.xlu1 %4442, %v4699_v14  }
 0x120   :  { %4071 = vmatpush3.msra.mxu1 %v579_v22  ;;  %4072 = vmatprep.mubr.f32.mxu1 %v646_v45 }
 0x121   :  { %4075 = vmatprep.subr.mxu1 %v667_v24 }
 0x127   :  { %4073 = vmatmul.mubr.f32.vlgmr.msra.gmra.mrb[2].mxu1 %v656_v44 }
 0x128   :  { %4076 = vmatpush3.msra.mxu1 %v667_v24  ;;  %4077 = vmatprep.mubr.f32.mxu1 %v644_v41  ;;  %v2108_v24 = vlaneseq }
 0x129   :  { %4080 = vmatprep.subr.mxu1 %v579_v22 }
 0x12a   :  { %v2109_v27 = vand.u32 127, %v2108_v24 }
 0x12c   :  { %vm2118_vm5 = vcmp.eq.s32.totalorder %v2109_v27, %v2114_v30  ;;  %vm2119_vm7 = vcmp.eq.s32.totalorder %v2109_v27, %v2117_v35 }
 0x12d   :  { %v3872_v32 = vsel %vm2118_vm5, 1.0, %v4467_v31  ;;  %v3873_v38 = vsel %vm2119_vm7, 1.0, %v4467_v31 }
 0x12e   :  { %v2130_v33 = vsel %vm61_vm0, %v3872_v32, %v2125_v29 }
 0x12f   :  { %4078 = vmatmul.mubr.f32.vlgmr.msra.gmra.mrb[2].mxu1 %v654_v40  ;;  %v2139_v34 = vsel %vm2137_vm6, %v2130_v33, 0 }
 0x130   :  { %4081 = vmatpush3.msra.mxu1 %v579_v22  ;;  %4082 = vmatprep.mubr.f32.mxu1 %v644_v41  ;;  %v2235_v22 = vsub.f32 %v2233_v17, %v2234_v19  ;;  %v4628_v37 = vand.u32 4294901760, %v2139_v34  ;;  %v3868_v17 = vld [vmem:[%s4776_s7] ss:$0 sm:$0xff] }
 0x132   :  { %v2236_v25 = vand.u32 4294901760, %v2235_v22  ;;  %v4631_v39 = vsub.f32 %v2139_v34, %v4628_v37 }
 0x134   :  { %v4275_v28 = vpack.c.bf16 %v2243_v26, %v2236_v25  ;;  %v4637_v43 = vand.u32 4294901760, %v4631_v39 }
 0x136   :  { %v2214_v45 = vsub.f32 %v4631_v39, %v4637_v43 }
 0x137   :  { %4083 = vmatmul.mubr.f32.vlgmr.msra.gmra.mrb[2].mxu1 %v654_v40  ;;  %v2131_v40 = vsel %vm61_vm0, %v3873_v38, %v2127_v36 }
 0x138   :  { %v2142_v41 = vsel %vm2137_vm6, %v2131_v40, 0  ;;  %v4644_v46 = vand.u32 4294901760, %v2214_v45  ;;  %v3876_v40 = vld [vmem:[%s4773_s10 + $0x20] sm:$0xff] }
 0x139   :  { %v4634_v42 = vand.u32 4294901760, %v2142_v41  ;;  %v2650_v45 = vand.u32 4294901760, %v3876_v40 }
 0x13b   :  { %v4640_v44 = vsub.f32 %v2142_v41, %v4634_v42  ;;  %v3877_v41 = vld [vmem:[%s4773_s10 + $0x28] sm:$0xff] }
 0x13d   :  { %v4647_v47 = vand.u32 4294901760, %v4640_v44 }
 0x13f   :  { %v2224_v48 = vsub.f32 %v4640_v44, %v4647_v47 }
 0x141   :  { %v4652_v49 = vand.u32 4294901760, %v2224_v48  ;;  %v2653_v48 = vand.u32 4294901760, %v3877_v41 }
 0x20a   :  { %v4084_v61 = vpop.f32.mrb[2].mxu1 }
 0x20b   :  { %v4605_v62 = vadd.f32 %v4084_v61, %v3867_v60  ;;  %v1057_v63 = vpop.f32.mrb[3].mxu1 }
 0x20c   :  { %v4607_v0 = vadd.f32 %v3867_v60, %v1057_v63 }
 0x20d   :  { %v1080_v1 = vsel %vm1075_vm4, %v4605_v62, 0 }
 0x20e   :  { %v1162_v3 = vand.u32 4294901760, %v1080_v1  ;;  %v1077_v4 = vsel %vm1075_vm4, %v4607_v0, 0 }
 0x20f   :  { %v1152_v2 = vand.u32 4294901760, %v1077_v4 }
 0x210   :  { %v1163_v5 = vsub.f32 %v1080_v1, %v1162_v3 }
 0x211   :  { %v1153_v6 = vsub.f32 %v1077_v4, %v1152_v2 }
 0x212   :  { %v1164_v7 = vand.u32 4294901760, %v1163_v5 }
 0x213   :  { %v1154_v8 = vand.u32 4294901760, %v1153_v6 }
 0x214   :  { %v1165_v9 = vsub.f32 %v1163_v5, %v1164_v7 }
 0x215   :  { %v1155_v10 = vsub.f32 %v1153_v6, %v1154_v8 }
 0x216   :  { %v1166_v12 = vand.u32 4294901760, %v1165_v9 }
 0x217   :  { %v1156_v11 = vand.u32 4294901760, %v1155_v10 }
 0x219   :  { %4087 = vmatprep.mubr.f32.mxu0 %v1156_v11 }
 0x21a   :  { %4088 = vmatmul.mubr.f32.vlgmr.msra.gmra.mrb[2].mxu0 %v1166_v12 }
 0x21b   :  { %4091 = vmatpush3.msra.mxu0 %v1177_v56  ;;  %4092 = vmatprep.mubr.f32.mxu0 %v1152_v2 }
 0x21c   :  { %4095 = vmatprep.subr.mxu0 %v1174_v53 }
 0x222   :  { %4093 = vmatmul.mubr.f32.vlgmr.msra.gmra.mrb[2].mxu0 %v1162_v3 }
 0x223   :  { %4096 = vmatpush3.msra.mxu0 %v1174_v53  ;;  %4097 = vmatprep.mubr.f32.mxu0 %v1153_v6  ;;  %v2133_v53 = vld [vmem:[%s4773_s10 + $0x8] sm:$0xff] }
 0x224   :  { %4100 = vmatprep.subr.mxu0 %v4587_v52  ;;  %v3165_v55 = vand.u32 4294901760, %v2133_v53 }
 0x226   :  { %v3257_v58 = vsub.f32 %v2133_v53, %v3165_v55 }
 0x228   :  { %v3258_v60 = vand.u32 4294901760, %v3257_v58 }
 0x22a   :  { %4098 = vmatmul.mubr.f32.vlgmr.msra.gmra.mrb[2].mxu0 %v1163_v5  ;;  %v3259_v1 = vsub.f32 %v3257_v58, %v3258_v60 }
 0x22b   :  { %4101 = vmatpush3.msra.mxu0 %v4587_v52  ;;  %4102 = vmatprep.mubr.f32.mxu0 %v1154_v8 }
 0x22c   :  { %4105 = vmatprep.subr.mxu0 %v1175_v54  ;;  %v3260_v4 = vand.u32 4294901760, %v3259_v1 }
 0x232   :  { %4103 = vmatmul.mubr.f32.vlgmr.msra.gmra.mrb[2].mxu0 %v1164_v7  ;;  %v1577_v7 = vld [vmem:[%s4774_s8] sm:$0x3f] }
 0x233   :  { %4106 = vmatpush3.msra.mxu0 %v1175_v54  ;;  %4107 = vmatprep.mubr.f32.mxu0 %v1152_v2  ;;  %v1592_v8 = vsel %vm574_vm1, %v1577_v7, 0  ;;  %v21_v7 = vstv %s4777_s13  ;;  %s4477_s13 = smov 4  }
 0x234   :  { %4110 = vmatprep.subr.mxu0 %v4587_v52  ;;  %v4688_v9 = vand.u32 4294901760, %v1592_v8  ;;  %22 = vst [vmem:[#allocation2] sm:$0x1] %v21_v7 }
 0x236   :  { %4115 = vmatprep.subr.mxu1 %v4688_v9  ;;  %v1682_v10 = vsub.f32 %v1592_v8, %v4688_v9  ;;  %v4476_v8 = vmov 9  }
 0x237   :  { %4116 = vmatpush3.msra.mxu1 %v4688_v9 }
 0x238   :  { %v1683_v11 = vand.u32 4294901760, %v1682_v10 }
 0x23a   :  { %4108 = vmatmul.mubr.f32.vlgmr.msra.gmra.mrb[2].mxu0 %v1162_v3  ;;  %v1684_v12 = vsub.f32 %v1682_v10, %v1683_v11 }
 0x23b   :  { %4111 = vmatpush3.msra.mxu0 %v4587_v52  ;;  %4112 = vmatprep.mubr.f32.mxu0 %v1152_v2  ;;  %v2132_v52 = vld [vmem:[%s4773_s10] sm:$0xff] }
 0x23c   :  { %4272 = vmatprep.subr.bf16.mxu0 %v4622_v21  ;;  %v3162_v54 = vand.u32 4294901760, %v2132_v52  ;;  %v1685_v13 = vand.u32 4294901760, %v1684_v12 }
 0x23e   :  { %v3250_v56 = vsub.f32 %v2132_v52, %v3162_v54  ;;  %v4319_v61 = vpack.c.bf16 %v3165_v55, %v3162_v54  ;;  %4120 = vmatprep.subr.mxu1 %v1685_v13  ;;  %v4295_v54 = vpack.c.bf16 %v2653_v48, %v2650_v45 }
 0x240   :  { %v3251_v59 = vand.u32 4294901760, %v3250_v56  ;;  %v4327_v5 = vpack.c.bf16 %v3257_v58, %v3250_v56 }
 0x242   :  { %4113 = vmatmul.mubr.f32.vlgmr.msra.gmra.mrb[2].mxu0 %v1162_v3  ;;  %v3252_v63 = vsub.f32 %v3250_v56, %v3251_v59  ;;  %v4335_v6 = vpack.c.bf16 %v3258_v60, %v3251_v59 }
 0x243   :  { %4274 = vmatpush3.bf16.msra.mxu0 %v4622_v21  ;;  %4149 = vmatprep.mubr.f32.mxu0 %v4644_v46 }
 0x244   :  { %4276 = vmatprep.subr.bf16.mxu0 %v4275_v28  ;;  %v3253_v3 = vand.u32 4294901760, %v3252_v63 }
 0x246   :  { %4150 = vmatmul.mubr.f32.vlgmr.msra.gmra.mrb[4].mxu0 %v4652_v49  ;;  %v4323_v2 = vpack.c.bf16 %v3260_v4, %v3253_v3 }
 0x247   :  { %4278 = vmatpush3.bf16.msra.mxu0 %v4275_v28  ;;  %4156 = vmatprep.mubr.f32.mxu0 %v4628_v37 }
 0x248   :  { %4280 = vmatprep.subr.bf16.mxu0 %v4279_v50 }
 0x24e   :  { %4157 = vmatmul.mubr.f32.vlgmr.msra.gmra.mrb[4].mxu0 %v4634_v42 }
 0x24f   :  { %4282 = vmatpush3.bf16.msra.mxu0 %v4279_v50  ;;  %4163 = vmatprep.mubr.f32.mxu0 %v4631_v39  ;;  %v2738_v50 = vsub.f32 %v3876_v40, %v2650_v45 }
 0x250   :  { %4284 = vmatprep.subr.bf16.mxu0 %v4622_v21 }
 0x251   :  { %v2739_v52 = vand.u32 4294901760, %v2738_v50 }
 0x253   :  { %v2740_v55 = vsub.f32 %v2738_v50, %v2739_v52 }
 0x255   :  { %v2741_v59 = vand.u32 4294901760, %v2740_v55 }
 0x256   :  { %4164 = vmatmul.mubr.f32.vlgmr.msra.gmra.mrb[4].mxu0 %v4640_v44 }
 0x257   :  { %4286 = vmatpush3.bf16.msra.mxu0 %v4622_v21  ;;  %4170 = vmatprep.mubr.f32.mxu0 %v4637_v43 }
 0x258   :  { %4288 = vmatprep.subr.bf16.mxu0 %v4287_v51 }
 0x25e   :  { %4171 = vmatmul.mubr.f32.vlgmr.msra.gmra.mrb[4].mxu0 %v4647_v47 }
 0x25f   :  { %4290 = vmatpush3.bf16.msra.mxu0 %v4287_v51  ;;  %4177 = vmatprep.mubr.f32.mxu0 %v4628_v37  ;;  %v2745_v51 = vsub.f32 %v3877_v41, %v2653_v48  ;;  %v3772_v41 = vpop.permute.xlu0 %3771 }
 0x260   :  { %4292 = vmatprep.subr.bf16.mxu0 %v4622_v21 }
 0x261   :  { %v2746_v53 = vand.u32 4294901760, %v2745_v51 }
 0x263   :  { %v2747_v56 = vsub.f32 %v2745_v51, %v2746_v53 }
 0x265   :  { %v2748_v60 = vand.u32 4294901760, %v2747_v56 }
 0x266   :  { %4178 = vmatmul.mubr.f32.vlgmr.msra.gmra.mrb[4].mxu0 %v4634_v42 }
 0x267   :  { %4294 = vmatpush3.bf16.msra.mxu0 %v4622_v21  ;;  %4184 = vmatprep.mubr.f32.mxu0 %v4628_v37 }
 0x268   :  { %4320 = vmatprep.subr.bf16.mxu0 %v4319_v61 }
 0x26e   :  { %4185 = vmatmul.mubr.f32.vlgmr.msra.gmra.mrb[4].mxu0 %v4634_v42 }
 0x26f   :  { %4322 = vmatpush3.bf16.msra.mxu0 %v4319_v61  ;;  %4233 = vmatprep.mubr.f32.mxu0 %v4644_v46 }
 0x270   :  { %4324 = vmatprep.subr.bf16.mxu0 %v4323_v2 }
 0x272   :  { %4234 = vmatmul.mubr.f32.vlgmr.msra.gmra.mrb[6].mxu0 %v4652_v49 }
 0x273   :  { %4326 = vmatpush3.bf16.msra.mxu0 %v4323_v2  ;;  %4240 = vmatprep.mubr.f32.mxu0 %v4628_v37  ;;  %v4299_v2 = vpack.c.bf16 %v2748_v60, %v2741_v59 }
 0x274   :  { %4328 = vmatprep.subr.bf16.mxu0 %v4327_v5 }
 0x27a   :  { %4241 = vmatmul.mubr.f32.vlgmr.msra.gmra.mrb[6].mxu0 %v4634_v42 }
 0x27b   :  { %4247 = vmatprep.mubr.f32.mxu0 %v4631_v39  ;;  %4330 = vmatpush3.bf16.msra.mxu0 %v4327_v5  ;;  %v4303_v5 = vpack.c.bf16 %v2745_v51, %v2738_v50 }
 0x27c   :  { %4332 = vmatprep.subr.bf16.mxu0 %v4319_v61 }
 0x282   :  { %4248 = vmatmul.mubr.f32.vlgmr.msra.gmra.mrb[6].mxu0 %v4640_v44 }
 0x283   :  { %4334 = vmatpush3.bf16.msra.mxu0 %v4319_v61  ;;  %4254 = vmatprep.mubr.f32.mxu0 %v4637_v43 }
 0x284   :  { %4336 = vmatprep.subr.bf16.mxu0 %v4335_v6 }
 0x28a   :  { %4255 = vmatmul.mubr.f32.vlgmr.msra.gmra.mrb[6].mxu0 %v4647_v47 }
 0x28b   :  { %4261 = vmatprep.mubr.f32.mxu0 %v4628_v37  ;;  %4338 = vmatpush3.bf16.msra.mxu0 %v4335_v6  ;;  %v4311_v6 = vpack.c.bf16 %v2746_v53, %v2739_v52 }
 0x28c   :  { %4340 = vmatprep.subr.bf16.mxu0 %v4319_v61 }
 0x292   :  { %4262 = vmatmul.mubr.f32.vlgmr.msra.gmra.mrb[6].mxu0 %v4634_v42 }
 0x293   :  { %4342 = vmatpush3.bf16.msra.mxu0 %v4319_v61  ;;  %4268 = vmatprep.mubr.f32.mxu0 %v4628_v37 }
 0x29a   :  { %4269 = vmatmul.mubr.f32.vlgmr.msra.gmra.mrb[6].mxu0 %v4634_v42 }
 0x315   :  { %v4114_v19 = vpop.f32.mrb[2].mxu0 }
 0x316   :  { %v4349_v20 = vadd.f32 %v4114_v19, %v3868_v17  ;;  %v1565_v21 = vpop.f32.mrb[3].mxu0 }
 0x317   :  { %v4350_v22 = vadd.f32 %v3868_v17, %v1565_v21 }
 0x318   :  { %4453 = vtanh.f32 %v4349_v20 }
 0x319   :  { %4455 = vtanh.f32 %v4350_v22 }
 0x322   :  { %v4454_v24 = vpop.eup %4453 }
 0x323   :  { %v4456_v25 = vpop.eup %4455  ;;  %v1589_v26 = vsel %vm567_vm2, %v4454_v24, 0 }
 0x324   :  { %v1670_v27 = vand.u32 4294901760, %v1589_v26  ;;  %v1586_v28 = vsel %vm567_vm2, %v4456_v25, 0 }
 0x325   :  { %v1660_v29 = vand.u32 4294901760, %v1586_v28 }
 0x326   :  { %v1671_v30 = vsub.f32 %v1589_v26, %v1670_v27 }
 0x327   :  { %v1661_v31 = vsub.f32 %v1586_v28, %v1660_v29 }
 0x328   :  { %v1672_v32 = vand.u32 4294901760, %v1671_v30 }
 0x329   :  { %v1662_v33 = vand.u32 4294901760, %v1661_v31 }
 0x32a   :  { %v1673_v34 = vsub.f32 %v1671_v30, %v1672_v32 }
 0x32b   :  { %v1663_v35 = vsub.f32 %v1661_v31, %v1662_v33 }
 0x32c   :  { %v1674_v38 = vand.u32 4294901760, %v1673_v34 }
 0x32d   :  { %v1664_v36 = vand.u32 4294901760, %v1663_v35 }
 0x32f   :  { %4117 = vmatprep.mubr.f32.mxu1 %v1664_v36  ;;  %v3766_v36 = vpop.permute.xlu1 %3765 }
 0x330   :  { %4118 = vmatmul.mubr.f32.vlgmr.msra.gmra.mrb[4].mxu1 %v1674_v38 }
 0x331   :  { %4121 = vmatpush3.msra.mxu1 %v1685_v13  ;;  %4122 = vmatprep.mubr.f32.mxu1 %v1660_v29 }
 0x332   :  { %4125 = vmatprep.subr.mxu1 %v1682_v10 }
 0x333   :  { %v3781_v38 = vpop.permute.xlu1 %3780 }
 0x337   :  { %v3799_v40 = vpop.permute.xlu1 %3798 }
 0x338   :  { %4123 = vmatmul.mubr.f32.vlgmr.msra.gmra.mrb[4].mxu1 %v1670_v27 }
 0x339   :  { %4126 = vmatpush3.msra.mxu1 %v1682_v10  ;;  %4127 = vmatprep.mubr.f32.mxu1 %v1661_v31  ;;  %v3869_v10 = vld [vmem:[%s4778_s9] ss:$0 sm:$0xff] }
 0x33a   :  { %4130 = vmatprep.subr.mxu1 %v4688_v9  ;;  %v3878_v31 = vld [vmem:[%s4779_s11] ss:$0 sm:$0xff] }
 0x33b   :  { %v3805_v45 = vpop.permute.xlu1 %3804 }
 0x340   :  { %4128 = vmatmul.mubr.f32.vlgmr.msra.gmra.mrb[4].mxu1 %v1671_v30 }
 0x341   :  { %4131 = vmatpush3.msra.mxu1 %v4688_v9  ;;  %4132 = vmatprep.mubr.f32.mxu1 %v1662_v33  ;;  %v4186_v58 = vpop.f32.mrb[4].mxu0 }
 0x342   :  { %4135 = vmatprep.subr.mxu1 %v1683_v11  ;;  %v3155_v61 = vrot.slane %v4186_v58, 1  ;;  %v2636_v63 = vpop.f32.mrb[5].mxu0 }
 0x343   :  { %v3154_v1 = vrot.slane %v2636_v63, 1 }
 0x345   :  { %v3160_v3 = vsel %vm3153_vm8, %v3155_v61, %v3154_v1  ;;  %v3156_v4 = vsel %vm3153_vm8, %v3154_v1, %v3155_v61 }
 0x348   :  { %4133 = vmatmul.mubr.f32.vlgmr.msra.gmra.mrb[4].mxu1 %v1672_v32 }
 0x349   :  { %4136 = vmatpush3.msra.mxu1 %v1683_v11  ;;  %4137 = vmatprep.mubr.f32.mxu1 %v1660_v29 }
 0x34a   :  { %4140 = vmatprep.subr.mxu1 %v4688_v9 }
 0x350   :  { %4138 = vmatmul.mubr.f32.vlgmr.msra.gmra.mrb[4].mxu1 %v1670_v27 }
 0x351   :  { %4141 = vmatpush3.msra.mxu1 %v4688_v9  ;;  %4142 = vmatprep.mubr.f32.mxu1 %v1660_v29  ;;  %v3880_v9 = vld [vmem:[#allocation2] ss:$0 sm:$0xff] }
 0x352   :  { %4296 = vmatprep.subr.bf16.mxu1 %v4295_v54 }
 0x358   :  { %4143 = vmatmul.mubr.f32.vlgmr.msra.gmra.mrb[4].mxu1 %v1670_v27 }
 0x359   :  { %4298 = vmatpush3.bf16.msra.mxu1 %v4295_v54  ;;  %4191 = vmatprep.mubr.f32.mxu1 %v4644_v46 }
 0x35a   :  { %4300 = vmatprep.subr.bf16.mxu1 %v4299_v2 }
 0x35c   :  { %4192 = vmatmul.mubr.f32.vlgmr.msra.gmra.mrb[6].mxu1 %v4652_v49 }
 0x35d   :  { %4198 = vmatprep.mubr.f32.mxu1 %v4628_v37  ;;  %4302 = vmatpush3.bf16.msra.mxu1 %v4299_v2 }
 0x35e   :  { %4304 = vmatprep.subr.bf16.mxu1 %v4303_v5 }
 0x364   :  { %4199 = vmatmul.mubr.f32.vlgmr.msra.gmra.mrb[6].mxu1 %v4634_v42 }
 0x365   :  { %4205 = vmatprep.mubr.f32.mxu1 %v4631_v39  ;;  %4306 = vmatpush3.bf16.msra.mxu1 %v4303_v5 }
 0x366   :  { %4308 = vmatprep.subr.bf16.mxu1 %v4295_v54 }
 0x36c   :  { %4206 = vmatmul.mubr.f32.vlgmr.msra.gmra.mrb[6].mxu1 %v4640_v44 }
 0x36d   :  { %4212 = vmatprep.mubr.f32.mxu1 %v4637_v43  ;;  %4310 = vmatpush3.bf16.msra.mxu1 %v4295_v54  ;;  %v4270_v39 = vpop.f32.mrb[6].mxu0  ;;  %v4472_v43 = vmov 3  }
 0x36e   :  { %4312 = vmatprep.subr.bf16.mxu1 %v4311_v6  ;;  %v4353_v46 = vadd.f32 %v4270_v39, %v3160_v3  ;;  %v3653_v44 = vpop.f32.mrb[7].mxu0  ;;  %4440 = vset.pattern.permute.xlu0 %v4472_v43 }
 0x36f   :  { %v4354_v49 = vadd.f32 %v3653_v44, %v3156_v4  ;;  %3789 = vperm.xlu0 %4440, %v4699_v14  }
 0x374   :  { %4213 = vmatmul.mubr.f32.vlgmr.msra.gmra.mrb[6].mxu1 %v4647_v47  ;;  %v4473_v47 = vmov 7  }
 0x375   :  { %4219 = vmatprep.mubr.f32.mxu1 %v4628_v37  ;;  %4314 = vmatpush3.bf16.msra.mxu1 %v4311_v6 }
 0x376   :  { %4316 = vmatprep.subr.bf16.mxu1 %v4295_v54  ;;  %4444 = vset.pattern.permute.xlu1 %v4473_v47 }
 0x377   :  { %3822 = vperm.xlu1 %4444, %v4699_v14  }
 0x37c   :  { %4220 = vmatmul.mubr.f32.vlgmr.msra.gmra.mrb[6].mxu1 %v4634_v42 }
 0x37d   :  { %4226 = vmatprep.mubr.f32.mxu1 %v4628_v37  ;;  %4318 = vmatpush3.bf16.msra.mxu1 %v4295_v54  ;;  %v4474_v37 = vmov 6  }
 0x37e   :  { %4443 = vset.pattern.permute.xlu0 %v4474_v37 }
 0x37f   :  { %3813 = vperm.xlu0 %4443, %v4699_v14  }
 0x383   :  { %4446 = vset.pattern.permute.xlu0 %v4476_v8 }
 0x384   :  { %4227 = vmatmul.mubr.f32.vlgmr.msra.gmra.mrb[6].mxu1 %v4634_v42  ;;  %v4475_v42 = vmov 8   ;;  %3837 = vperm.xlu0 %4446, %v4699_v14  }
 0x385   :  { %4445 = vset.pattern.permute.xlu1 %v4475_v42 }
 0x386   :  { %3831 = vperm.xlu1 %4445, %v4699_v14  }
 0x38a   :  { %4447 = vset.pattern.permute.xlu1 %v4465_v57 }
 0x38b   :  { %3852 = vperm.xlu1 %4447, %v3880_v9  }
 0x3ee   :  { %v3790_v48 = vpop.permute.xlu0 %3789 }
 0x3f6   :  { %v3823_v50 = vpop.permute.xlu1 %3822 }
 0x3fe   :  { %v3814_v51 = vpop.permute.xlu0 %3813 }
 0x403   :  { %v3838_v53 = vpop.permute.xlu0 %3837 }
 0x405   :  { %v3832_v52 = vpop.permute.xlu1 %3831 }
 0x40a   :  { %v3853_v54 = vpop.permute.xlu1 %3852 }
 0x42b   :  { %v4144_v11 = vpop.f32.mrb[4].mxu1 }
 0x42c   :  { %v4351_v12 = vadd.f32 %v4144_v11, %v3869_v10  ;;  %v2073_v13 = vpop.f32.mrb[5].mxu1 }
 0x42d   :  { %v4352_v15 = vadd.f32 %v3869_v10, %v2073_v13 }
 0x42e   :  { %v3871_v16 = vmul.f32 -1.442695, %v4351_v12 }
 0x42f   :  { %v3870_v17 = vmul.f32 -1.442695, %v4352_v15 }
 0x430   :  { %4457 = vpow2.f32 %v3871_v16 }
 0x431   :  { %4459 = vpow2.f32 %v3870_v17 }
 0x43a   :  { %v4458_v18 = vpop.eup %4457 }
 0x43b   :  { %v4460_v19 = vpop.eup %4459  ;;  %v2090_v20 = vadd.f32 1.0, %v4458_v18 }
 0x43c   :  { %v2089_v14 = vadd.f32 1.0, %v4460_v19 }
 0x43d   :  { %4461 = vrcp.f32 %v2090_v20 }
 0x43e   :  { %4463 = vrcp.f32 %v2089_v14 }
 0x447   :  { %v4462_v21 = vpop.eup %4461 }
 0x448   :  { %v4464_v22 = vpop.eup %4463  ;;  %2099 = vrot.lane.b32.xlu0 %v4462_v21, %s4477_s13 }
 0x449   :  { %2097 = vrot.lane.b32.xlu1 %v4464_v22, %s4477_s13 }
 0x457   :  { %v4228_v23 = vpop.f32.mrb[6].mxu1 }
 0x458   :  { %v3666_v24 = vrot.slane %v4228_v23, 2  ;;  %v3141_v25 = vpop.f32.mrb[7].mxu1 }
 0x459   :  { %v3665_v26 = vrot.slane %v3141_v25, 2 }
 0x45b   :  { %v3667_v27 = vsel %vm574_vm1, %v3665_v26, %v3666_v24  ;;  %v3671_v28 = vsel %vm574_vm1, %v3666_v24, %v3665_v26 }
 0x45c   :  { %v3672_v29 = vadd.f32 %v4354_v49, %v3667_v27  ;;  %v3673_v30 = vadd.f32 %v4353_v46, %v3671_v28 }
 0x45e   :  { %v3682_v32 = vadd.f32 %v3878_v31, %v3673_v30  ;;  %v3681_v34 = vadd.f32 %v3878_v31, %v3672_v29 }
 0x460   :  { %v3684_v33 = vmax.f32 %v3682_v32, 0.0  ;;  %v3683_v35 = vmax.f32 %v3681_v34, 0.0 }
 0x466   :  { %3717 = vxpose.xlu0.b32.start.end [1/1] (short) (narrow) %v3684_v33, 16 }
 0x472   :  { %3685 = vxpose.xlu1.b32.start.end [1/1] (short) (narrow) %v3683_v35, 16 }
 0x48f   :  { %4448 = vset.pattern.permute.xlu0 %v4465_v57 }
 0x4ba   :  { %v2100_v55 = vpop.permute.xlu0 %2099 }
 0x4bb   :  { %v2104_v56 = vsel %vm1075_vm4, %v4605_v62, %v2100_v55  ;;  %v2098_v58 = vpop.permute.xlu1 %2097 }
 0x4bc   :  { %2107 = vst.msk [vmem:[%s4780_s14 + $0x8] sm:$0xff] %vm2105_vm9, %v2104_v56  ;;  %v2103_v57 = vsel %vm1075_vm4, %v4607_v0, %v2098_v58 }
 0x4bd   :  { %2106 = vst.msk [vmem:[%s4780_s14] sm:$0xff] %vm2105_vm9, %v2103_v57 }
 0x4e6   :  { %v3733_v59 = vpop.trf.xlu0 }
 0x4e7   :  { %v3752_v1 = vrot.slane %v3733_v59, 6 }
 0x4ea   :  { %v3734_v5 = vpop.trf.xlu0 }
 0x4eb   :  { %v3753_v43 = vrot.slane %v3734_v5, 6 }
 0x4ed   :  { %v3754_v10 = vsel %vm3751_vm10, %v3752_v1, %v3753_v43 }
 0x4ee   :  { %v3840_v13 = vmul.f32 %v3838_v53, %v3754_v10  ;;  %v3834_v17 = vmul.f32 %v3832_v52, %v3754_v10 }
 0x4f0   :  { %v3842_v19 = vrot.slane %v3840_v13, 2 }
 0x4f2   :  { %v3701_v60 = vpop.trf.xlu1 }
 0x4f3   :  { %v3774_v61 = vmul.f32 %v3772_v41, %v3701_v60  ;;  %v3783_v63 = vmul.f32 %v3781_v38, %v3701_v60  ;;  %v3768_v3 = vmul.f32 %v3766_v36, %v3701_v60  ;;  %v3792_v62 = vmul.f32 %v3790_v48, %v3701_v60 }
 0x4f5   :  { %v3776_v4 = vrot.slane %v3774_v61, 2  ;;  %v3785_v39 = vrot.slane %v3783_v63, 4  ;;  %v3794_v44 = vrot.slane %v3792_v62, 6 }
 0x4f6   :  { %v3702_v2 = vpop.trf.xlu1 }
 0x4f7   :  { %v3778_v6 = vadd.f32 %v3776_v4, %v3768_v3  ;;  %v3757_v46 = vsel %vm3751_vm10, %v3702_v2, %v3752_v1 }
 0x4f8   :  { %v3807_v49 = vmul.f32 %v3805_v45, %v3757_v46  ;;  %v3801_v7 = vmul.f32 %v3799_v40, %v3757_v46  ;;  %v3816_v37 = vmul.f32 %v3814_v51, %v3757_v46  ;;  %v3825_v9 = vmul.f32 %v3823_v50, %v3757_v46 }
 0x4f9   :  { %v3787_v0 = vadd.f32 %v3785_v39, %v3778_v6 }
 0x4fa   :  { %v3809_v8 = vrot.slane %v3807_v49, 2  ;;  %v3818_v12 = vrot.slane %v3816_v37, 4  ;;  %v3827_v16 = vrot.slane %v3825_v9, 6 }
 0x4fb   :  { %v3796_v47 = vadd.f32 %v3794_v44, %v3787_v0 }
 0x4fd   :  { %v3802_v42 = vadd.f32 %v3801_v7, %v3796_v47 }
 0x4ff   :  { %v3811_v11 = vadd.f32 %v3809_v8, %v3802_v42 }
 0x501   :  { %v3820_v15 = vadd.f32 %v3818_v12, %v3811_v11 }
 0x503   :  { %v3829_v18 = vadd.f32 %v3827_v16, %v3820_v15 }
 0x505   :  { %v3835_v20 = vadd.f32 %v3834_v17, %v3829_v18 }
 0x507   :  { %v3844_v14 = vadd.f32 %v3842_v19, %v3835_v20 }
 0x509   :  { %v3855_v21 = vadd.f32 %v3853_v54, %v3844_v14 }
 0x50b   :  { %3857 = vst.msk [vmem:[%s4781_s15] sm:$0x3] %vm3856_vm11, %v3855_v21 }

</bundles_post_ra>
